<compile_context>
chip_gen: v7x
topology: tpu7x:2x2x1
jax: 0.10.0
libtpu: 0.0.40
codegen_flags: <defaults>
</compile_context>

<pallas_src>
import functools
import math

import jax
import jax.numpy as jnp
from jax.experimental import pallas as pl
from jax.experimental.pallas import tpu as pltpu

# ---------------- configuration (matches the nn.Module __init__) ----------------
N_HEADS = 4
D_MODEL = 32
D_HEAD = D_MODEL // N_HEADS + 1          # note the "+1" quirk in the module: 9
D_INNER = N_HEADS * D_HEAD               # 36
D_HEAD_P = 16                            # padded per-head width (aligned slices)
D_INNER_P = N_HEADS * D_HEAD_P           # 64


def _mha_kernel(q_ref, k_ref, v_ref,
                wq_ref, bq_ref, wk_ref, bk_ref, wv_ref, bv_ref,
                wo_ref, bo_ref,
                out_ref, *, b_tile, sq, sk, mxu_dtype):
    """One batch-tile of fused MHA.

    q_ref:  (b_tile*sq, D_MODEL)     k_ref/v_ref: (b_tile*sk, D_MODEL)
    wq/wk/wv: (D_MODEL, D_INNER_P)   bq/bk/bv: (1, D_INNER_P)   [head-padded]
    wo: (D_INNER_P, D_MODEL)         bo: (1, D_MODEL)
    out_ref: (b_tile*sq, D_MODEL)
    The softmax scale 1/sqrt(D_HEAD) is pre-folded into wq/bq by the wrapper.
    """
    f32 = jnp.float32

    def mx(x):
        # Cast MXU operand inputs only (bf16 on v6e/v7x); accumulation stays f32.
        return x if mxu_dtype is None else x.astype(mxu_dtype)

    # --- fused input projections: one full-width matmul each ----------------
    q_proj = jnp.dot(mx(q_ref[...]), mx(wq_ref[...]),
                     preferred_element_type=f32) + bq_ref[...]
    k_proj = jnp.dot(mx(k_ref[...]), mx(wk_ref[...]),
                     preferred_element_type=f32) + bk_ref[...]
    v_proj = jnp.dot(mx(v_ref[...]), mx(wv_ref[...]),
                     preferred_element_type=f32) + bv_ref[...]

    # --- attention: static loops over the (small) batch tile and heads ------
    # Padded head columns (9..15 of each 16-wide head) are exactly zero in
    # q_proj/k_proj/v_proj, so contracting over the padded width is exact.
    per_batch_concat = []
    for b in range(b_tile):
        r0 = b * sq          # query rows of this batch element
        c0 = b * sk          # key/value rows of this batch element
        heads = []
        for h in range(N_HEADS):
            h0 = h * D_HEAD_P
            qh = q_proj[r0:r0 + sq, h0:h0 + D_HEAD_P]        # (sq, 16)
            kh = k_proj[c0:c0 + sk, h0:h0 + D_HEAD_P]        # (sk, 16)
            vh = v_proj[c0:c0 + sk, h0:h0 + D_HEAD_P]        # (sk, 16)

            # scores: contract last dims directly (no explicit transpose);
            # scale already folded into the Q projection weights/bias.
            s = jax.lax.dot_general(
                mx(qh), mx(kh), (((1,), (1,)), ((), ())),
                preferred_element_type=f32)                   # (sq, sk)

            # numerically stable softmax; divide replaced by EUP reciprocal
            s = s - jnp.max(s, axis=-1, keepdims=True)
            p = jnp.exp(s)
            p = p * pl.reciprocal(jnp.sum(p, axis=-1, keepdims=True), approx=True)

            oh = jnp.dot(mx(p), mx(vh), preferred_element_type=f32)  # (sq, 16)
            heads.append(oh)

        per_batch_concat.append(jnp.concatenate(heads, axis=-1))     # (sq, 64)

    concat = (per_batch_concat[0] if b_tile == 1
              else jnp.concatenate(per_batch_concat, axis=0))        # (rows, 64)

    # --- fused output projection: one matmul + bias, one full-block store ---
    out = jnp.dot(mx(concat), mx(wo_ref[...]),
                  preferred_element_type=f32) + bo_ref[...]
    out_ref[...] = out.astype(out_ref.dtype)


def _pad_heads_last(x):
    """Zero-pad each head's block on the last axis: (..., 4*9) -> (..., 4*16)."""
    lead = x.shape[:-1]
    x4 = x.reshape(*lead, N_HEADS, D_HEAD)
    pad = [(0, 0)] * (x4.ndim - 1) + [(0, D_HEAD_P - D_HEAD)]
    return jnp.pad(x4, pad).reshape(*lead, D_INNER_P)


def _pad_heads_first(x):
    """Zero-pad each head's block on the first axis: (4*9, d) -> (4*16, d)."""
    d = x.shape[-1]
    x4 = x.reshape(N_HEADS, D_HEAD, d)
    return jnp.pad(x4, ((0, 0), (0, D_HEAD_P - D_HEAD), (0, 0))).reshape(D_INNER_P, d)


def multi_head_attention(q, k, v, params, *, b_tile=None, mxu_dtype=None):
    """q: (B, Sq, d_model), k/v: (B, Sk, d_model). Returns (B, Sq, d_model)."""
    B, Sq, Dm = q.shape
    Sk, Sv = k.shape[1], v.shape[1]
    assert Dm == D_MODEL and Sk == Sv

    if b_tile is None:
        # Give the 'parallel' batch axis >= 2 grid steps (largest divisor of B
        # that is <= B//2) so v7x's two TensorCores both get work; the extra
        # ~0.35 us/step is neutral on single-TC v5e/v6e.
        b_tile = next((t for t in range(B // 2, 0, -1) if B % t == 0), B) if B > 1 else B
    assert B % b_tile == 0

    # Flatten batch*seq into rows (free row-major reshape in the wrapper) so the
    # projections run as single (rows, 32) @ (32, 64) matmuls per grid step.
    q2 = q.reshape(B * Sq, D_MODEL)
    k2 = k.reshape(B * Sk, D_MODEL)
    v2 = v.reshape(B * Sv, D_MODEL)

    # Weight prep (wrapper side, cheap / cacheable):
    #   * fold the softmax scale 1/sqrt(d_head) into the Q projection,
    #   * head-pad 9 -> 16 so all in-kernel head slices are aligned.
    scale = 1.0 / math.sqrt(D_HEAD)
    wq_p = _pad_heads_last(params["wq"] * scale)                       # (32, 64)
    bq_p = _pad_heads_last(params["bq"] * scale).reshape(1, D_INNER_P)
    wk_p = _pad_heads_last(params["wk"])                               # (32, 64)
    bk_p = _pad_heads_last(params["bk"]).reshape(1, D_INNER_P)
    wv_p = _pad_heads_last(params["wv"])                               # (32, 64)
    bv_p = _pad_heads_last(params["bv"]).reshape(1, D_INNER_P)
    wo_p = _pad_heads_first(params["wo"])                              # (64, 32)
    bo_p = params["bo"].reshape(1, D_MODEL)

    def whole(arr):                     # full-array block, constant index_map
        return pl.BlockSpec(arr.shape, lambda i: (0,) * arr.ndim)

    kernel = functools.partial(_mha_kernel, b_tile=b_tile, sq=Sq, sk=Sk,
                               mxu_dtype=mxu_dtype)

    out2 = pl.pallas_call(
        kernel,
        out_shape=jax.ShapeDtypeStruct((B * Sq, D_MODEL), q.dtype),
        grid_spec=pl.GridSpec(
            grid=(B // b_tile,),
            in_specs=[
                pl.BlockSpec((b_tile * Sq, D_MODEL), lambda i: (i, 0)),
                pl.BlockSpec((b_tile * Sk, D_MODEL), lambda i: (i, 0)),
                pl.BlockSpec((b_tile * Sv, D_MODEL), lambda i: (i, 0)),
                whole(wq_p), whole(bq_p), whole(wk_p), whole(bk_p),
                whole(wv_p), whole(bv_p), whole(wo_p), whole(bo_p),
            ],
            out_specs=pl.BlockSpec((b_tile * Sq, D_MODEL), lambda i: (i, 0)),
        ),
        compiler_params=pltpu.CompilerParams(
            dimension_semantics=("parallel",)),
    )(q2, k2, v2, wq_p, bq_p, wk_p, bk_p, wv_p, bv_p, wo_p, bo_p)

    return out2.reshape(B, Sq, D_MODEL)


def _reference(q, k, v, params):
    """Pure-JAX reference mirroring the PyTorch forward (eval mode, mask=None)."""
    B, Sq, _ = q.shape
    q_lin = q @ params["wq"] + params["bq"]
    k_lin = k @ params["wk"] + params["bk"]
    v_lin = v @ params["wv"] + params["bv"]
    qh = q_lin.reshape(B, Sq, N_HEADS, D_HEAD).transpose(0, 2, 1, 3)
    kh = k_lin.reshape(B, -1, N_HEADS, D_HEAD).transpose(0, 2, 1, 3)
    vh = v_lin.reshape(B, -1, N_HEADS, D_HEAD).transpose(0, 2, 1, 3)
    s = jnp.einsum("bhqd,bhkd->bhqk", qh, kh) / math.sqrt(D_HEAD)
    p = jax.nn.softmax(s, axis=-1)
    o = jnp.einsum("bhqk,bhkd->bhqd", p, vh)
    concat = o.transpose(0, 2, 1, 3).reshape(B, Sq, N_HEADS * D_HEAD)
    return concat @ params["wo"] + params["bo"]


def _init_params(key):
    """Deterministic Linear-style init (uniform +/- 1/sqrt(fan_in))."""
    keys = jax.random.split(key, 8)

    def lin(kw, kb, fan_in, fan_out):
        bound = 1.0 / math.sqrt(fan_in)
        w = jax.random.uniform(kw, (fan_in, fan_out), jnp.float32, -bound, bound)
        b = jax.random.uniform(kb, (fan_out,), jnp.float32, -bound, bound)
        return w, b

    wq, bq = lin(keys[0], keys[1], D_MODEL, D_INNER)
    wk, bk = lin(keys[2], keys[3], D_MODEL, D_INNER)
    wv, bv = lin(keys[4], keys[5], D_MODEL, D_INNER)
    wo, bo = lin(keys[6], keys[7], D_INNER, D_MODEL)
    return dict(wq=wq, bq=bq, wk=wk, bk=bk, wv=wv, bv=bv, wo=wo, bo=bo)


if __name__ == "__main__":
    B, S = 2, 8
    key = jax.random.PRNGKey(0)
    kq, kk, kv, kp = jax.random.split(key, 4)
    q = jax.random.normal(kq, (B, S, D_MODEL), jnp.float32)
    k = jax.random.normal(kk, (B, S, D_MODEL), jnp.float32)
    v = jax.random.normal(kv, (B, S, D_MODEL), jnp.float32)
    params = _init_params(kp)

    # Default: f32 MXU operands (bit-safe).  On v6e/v7x at production sizes,
    # pass mxu_dtype=jnp.bfloat16 and relax tolerances (~1e-2 rel).
    out = multi_head_attention(q, k, v, params)
    out = jax.block_until_ready(out)

    ref = _reference(q, k, v, params)
    assert out.shape == (B, S, D_MODEL)
    # tolerance slightly relaxed for the approximate (EUP) softmax reciprocal
    assert jnp.allclose(out, ref, atol=2e-3, rtol=2e-3), "mismatch vs JAX reference"
    print("KERNEL_OK")
</pallas_src>

<mosaic_0001>
module attributes {stable_mosaic.version = 11 : i64} {
  func.func @_mha_kernel(%arg0: i32, %arg1: memref<8x32xf32, #tpu.memory_space<vmem>>, %arg2: memref<8x32xf32, #tpu.memory_space<vmem>>, %arg3: memref<8x32xf32, #tpu.memory_space<vmem>>, %arg4: memref<32x64xf32, #tpu.memory_space<vmem>>, %arg5: memref<1x64xf32, #tpu.memory_space<vmem>>, %arg6: memref<32x64xf32, #tpu.memory_space<vmem>>, %arg7: memref<1x64xf32, #tpu.memory_space<vmem>>, %arg8: memref<32x64xf32, #tpu.memory_space<vmem>>, %arg9: memref<1x64xf32, #tpu.memory_space<vmem>>, %arg10: memref<64x32xf32, #tpu.memory_space<vmem>>, %arg11: memref<1x32xf32, #tpu.memory_space<vmem>>, %arg12: memref<8x32xf32, #tpu.memory_space<vmem>>) attributes {dimension_semantics = [#tpu.dimension_semantics<parallel>], iteration_bounds = array<i64: 2>, scalar_prefetch = 0 : i64, scratch_operands = 0 : i64, tpu.core_type = #tpu.core_type<tc>, window_params = [{transform_indices = @transform_0, window_bounds = array<i64: 8, 32>}, {transform_indices = @transform_1, window_bounds = array<i64: 8, 32>}, {transform_indices = @transform_2, window_bounds = array<i64: 8, 32>}, {pipeline_mode = #tpu.pipeline_mode<synchronous>, transform_indices = @transform_3, window_bounds = array<i64: 32, 64>}, {pipeline_mode = #tpu.pipeline_mode<synchronous>, transform_indices = @transform_4, window_bounds = array<i64: 1, 64>}, {pipeline_mode = #tpu.pipeline_mode<synchronous>, transform_indices = @transform_5, window_bounds = array<i64: 32, 64>}, {pipeline_mode = #tpu.pipeline_mode<synchronous>, transform_indices = @transform_6, window_bounds = array<i64: 1, 64>}, {pipeline_mode = #tpu.pipeline_mode<synchronous>, transform_indices = @transform_7, window_bounds = array<i64: 32, 64>}, {pipeline_mode = #tpu.pipeline_mode<synchronous>, transform_indices = @transform_8, window_bounds = array<i64: 1, 64>}, {pipeline_mode = #tpu.pipeline_mode<synchronous>, transform_indices = @transform_9, window_bounds = array<i64: 64, 32>}, {pipeline_mode = #tpu.pipeline_mode<synchronous>, transform_indices = @transform_10, window_bounds = array<i64: 1, 32>}, {transform_indices = @transform_11, window_bounds = array<i64: 8, 32>}]} {
    %c0 = arith.constant 0 : index
    %c0_0 = arith.constant 0 : index
    %0 = vector.load %arg1[%c0, %c0_0] : memref<8x32xf32, #tpu.memory_space<vmem>>, vector<8x32xf32>
    %c0_1 = arith.constant 0 : index
    %c0_2 = arith.constant 0 : index
    %1 = vector.load %arg4[%c0_1, %c0_2] : memref<32x64xf32, #tpu.memory_space<vmem>>, vector<32x64xf32>
    %cst = arith.constant dense<0.000000e+00> : vector<8x64xf32>
    %2 = tpu.matmul %0, %1, %cst {dimension_numbers = #tpu.dot_dimension_numbers<[1], [0], [0], [1], [0, 0, 1, 1], [], []>} : vector<8x32xf32>, vector<32x64xf32>, vector<8x64xf32> -> vector<8x64xf32>
    %c0_3 = arith.constant 0 : index
    %c0_4 = arith.constant 0 : index
    %3 = vector.load %arg5[%c0_3, %c0_4] : memref<1x64xf32, #tpu.memory_space<vmem>>, vector<1x64xf32>
    %4 = vector.broadcast %3 : vector<1x64xf32> to vector<8x64xf32>
    %5 = arith.addf %2, %4 : vector<8x64xf32>
    %c0_5 = arith.constant 0 : index
    %c0_6 = arith.constant 0 : index
    %6 = vector.load %arg2[%c0_5, %c0_6] : memref<8x32xf32, #tpu.memory_space<vmem>>, vector<8x32xf32>
    %c0_7 = arith.constant 0 : index
    %c0_8 = arith.constant 0 : index
    %7 = vector.load %arg6[%c0_7, %c0_8] : memref<32x64xf32, #tpu.memory_space<vmem>>, vector<32x64xf32>
    %cst_9 = arith.constant dense<0.000000e+00> : vector<8x64xf32>
    %8 = tpu.matmul %6, %7, %cst_9 {dimension_numbers = #tpu.dot_dimension_numbers<[1], [0], [0], [1], [0, 0, 1, 1], [], []>} : vector<8x32xf32>, vector<32x64xf32>, vector<8x64xf32> -> vector<8x64xf32>
    %c0_10 = arith.constant 0 : index
    %c0_11 = arith.constant 0 : index
    %9 = vector.load %arg7[%c0_10, %c0_11] : memref<1x64xf32, #tpu.memory_space<vmem>>, vector<1x64xf32>
    %10 = vector.broadcast %9 : vector<1x64xf32> to vector<8x64xf32>
    %11 = arith.addf %8, %10 : vector<8x64xf32>
    %c0_12 = arith.constant 0 : index
    %c0_13 = arith.constant 0 : index
    %12 = vector.load %arg3[%c0_12, %c0_13] : memref<8x32xf32, #tpu.memory_space<vmem>>, vector<8x32xf32>
    %c0_14 = arith.constant 0 : index
    %c0_15 = arith.constant 0 : index
    %13 = vector.load %arg8[%c0_14, %c0_15] : memref<32x64xf32, #tpu.memory_space<vmem>>, vector<32x64xf32>
    %cst_16 = arith.constant dense<0.000000e+00> : vector<8x64xf32>
    %14 = tpu.matmul %12, %13, %cst_16 {dimension_numbers = #tpu.dot_dimension_numbers<[1], [0], [0], [1], [0, 0, 1, 1], [], []>} : vector<8x32xf32>, vector<32x64xf32>, vector<8x64xf32> -> vector<8x64xf32>
    %c0_17 = arith.constant 0 : index
    %c0_18 = arith.constant 0 : index
    %15 = vector.load %arg9[%c0_17, %c0_18] : memref<1x64xf32, #tpu.memory_space<vmem>>, vector<1x64xf32>
    %16 = vector.broadcast %15 : vector<1x64xf32> to vector<8x64xf32>
    %17 = arith.addf %14, %16 : vector<8x64xf32>
    %18 = vector.extract_strided_slice %5 {offsets = [0, 0], sizes = [8, 16], strides = [1, 1]} : vector<8x64xf32> to vector<8x16xf32>
    %19 = vector.extract_strided_slice %11 {offsets = [0, 0], sizes = [8, 16], strides = [1, 1]} : vector<8x64xf32> to vector<8x16xf32>
    %20 = vector.extract_strided_slice %17 {offsets = [0, 0], sizes = [8, 16], strides = [1, 1]} : vector<8x64xf32> to vector<8x16xf32>
    %cst_19 = arith.constant dense<0.000000e+00> : vector<8x8xf32>
    %21 = tpu.matmul %18, %19, %cst_19 {dimension_numbers = #tpu.dot_dimension_numbers<[1], [1], [0], [0], [0, 0, 1, 0], [], []>} : vector<8x16xf32>, vector<8x16xf32>, vector<8x8xf32> -> vector<8x8xf32>
    %cst_20 = arith.constant dense<0xFF800000> : vector<8xf32>
    %22 = vector.multi_reduction <maximumf>, %21, %cst_20 [1] : vector<8x8xf32> to vector<8xf32>
    %23 = vector.shape_cast %22 : vector<8xf32> to vector<8x1xf32>
    %24 = vector.broadcast %23 : vector<8x1xf32> to vector<8x8xf32>
    %25 = arith.subf %21, %24 : vector<8x8xf32>
    %26 = math.exp %25 : vector<8x8xf32>
    %cst_21 = arith.constant dense<0.000000e+00> : vector<8xf32>
    %27 = vector.multi_reduction <add>, %26, %cst_21 [1] : vector<8x8xf32> to vector<8xf32>
    %28 = vector.shape_cast %27 : vector<8xf32> to vector<8x1xf32>
    %29 = tpu.reciprocal %28 {approx = true} : vector<8x1xf32> -> vector<8x1xf32>
    %30 = vector.broadcast %29 : vector<8x1xf32> to vector<8x8xf32>
    %31 = arith.mulf %26, %30 : vector<8x8xf32>
    %cst_22 = arith.constant dense<0.000000e+00> : vector<8x16xf32>
    %32 = tpu.matmul %31, %20, %cst_22 {dimension_numbers = #tpu.dot_dimension_numbers<[1], [0], [0], [1], [0, 0, 1, 1], [], []>} : vector<8x8xf32>, vector<8x16xf32>, vector<8x16xf32> -> vector<8x16xf32>
    %33 = vector.extract_strided_slice %5 {offsets = [0, 16], sizes = [8, 16], strides = [1, 1]} : vector<8x64xf32> to vector<8x16xf32>
    %34 = vector.extract_strided_slice %11 {offsets = [0, 16], sizes = [8, 16], strides = [1, 1]} : vector<8x64xf32> to vector<8x16xf32>
    %35 = vector.extract_strided_slice %17 {offsets = [0, 16], sizes = [8, 16], strides = [1, 1]} : vector<8x64xf32> to vector<8x16xf32>
    %cst_23 = arith.constant dense<0.000000e+00> : vector<8x8xf32>
    %36 = tpu.matmul %33, %34, %cst_23 {dimension_numbers = #tpu.dot_dimension_numbers<[1], [1], [0], [0], [0, 0, 1, 0], [], []>} : vector<8x16xf32>, vector<8x16xf32>, vector<8x8xf32> -> vector<8x8xf32>
    %cst_24 = arith.constant dense<0xFF800000> : vector<8xf32>
    %37 = vector.multi_reduction <maximumf>, %36, %cst_24 [1] : vector<8x8xf32> to vector<8xf32>
    %38 = vector.shape_cast %37 : vector<8xf32> to vector<8x1xf32>
    %39 = vector.broadcast %38 : vector<8x1xf32> to vector<8x8xf32>
    %40 = arith.subf %36, %39 : vector<8x8xf32>
    %41 = math.exp %40 : vector<8x8xf32>
    %cst_25 = arith.constant dense<0.000000e+00> : vector<8xf32>
    %42 = vector.multi_reduction <add>, %41, %cst_25 [1] : vector<8x8xf32> to vector<8xf32>
    %43 = vector.shape_cast %42 : vector<8xf32> to vector<8x1xf32>
    %44 = tpu.reciprocal %43 {approx = true} : vector<8x1xf32> -> vector<8x1xf32>
    %45 = vector.broadcast %44 : vector<8x1xf32> to vector<8x8xf32>
    %46 = arith.mulf %41, %45 : vector<8x8xf32>
    %cst_26 = arith.constant dense<0.000000e+00> : vector<8x16xf32>
    %47 = tpu.matmul %46, %35, %cst_26 {dimension_numbers = #tpu.dot_dimension_numbers<[1], [0], [0], [1], [0, 0, 1, 1], [], []>} : vector<8x8xf32>, vector<8x16xf32>, vector<8x16xf32> -> vector<8x16xf32>
    %48 = vector.extract_strided_slice %5 {offsets = [0, 32], sizes = [8, 16], strides = [1, 1]} : vector<8x64xf32> to vector<8x16xf32>
    %49 = vector.extract_strided_slice %11 {offsets = [0, 32], sizes = [8, 16], strides = [1, 1]} : vector<8x64xf32> to vector<8x16xf32>
    %50 = vector.extract_strided_slice %17 {offsets = [0, 32], sizes = [8, 16], strides = [1, 1]} : vector<8x64xf32> to vector<8x16xf32>
    %cst_27 = arith.constant dense<0.000000e+00> : vector<8x8xf32>
    %51 = tpu.matmul %48, %49, %cst_27 {dimension_numbers = #tpu.dot_dimension_numbers<[1], [1], [0], [0], [0, 0, 1, 0], [], []>} : vector<8x16xf32>, vector<8x16xf32>, vector<8x8xf32> -> vector<8x8xf32>
    %cst_28 = arith.constant dense<0xFF800000> : vector<8xf32>
    %52 = vector.multi_reduction <maximumf>, %51, %cst_28 [1] : vector<8x8xf32> to vector<8xf32>
    %53 = vector.shape_cast %52 : vector<8xf32> to vector<8x1xf32>
    %54 = vector.broadcast %53 : vector<8x1xf32> to vector<8x8xf32>
    %55 = arith.subf %51, %54 : vector<8x8xf32>
    %56 = math.exp %55 : vector<8x8xf32>
    %cst_29 = arith.constant dense<0.000000e+00> : vector<8xf32>
    %57 = vector.multi_reduction <add>, %56, %cst_29 [1] : vector<8x8xf32> to vector<8xf32>
    %58 = vector.shape_cast %57 : vector<8xf32> to vector<8x1xf32>
    %59 = tpu.reciprocal %58 {approx = true} : vector<8x1xf32> -> vector<8x1xf32>
    %60 = vector.broadcast %59 : vector<8x1xf32> to vector<8x8xf32>
    %61 = arith.mulf %56, %60 : vector<8x8xf32>
    %cst_30 = arith.constant dense<0.000000e+00> : vector<8x16xf32>
    %62 = tpu.matmul %61, %50, %cst_30 {dimension_numbers = #tpu.dot_dimension_numbers<[1], [0], [0], [1], [0, 0, 1, 1], [], []>} : vector<8x8xf32>, vector<8x16xf32>, vector<8x16xf32> -> vector<8x16xf32>
    %63 = vector.extract_strided_slice %5 {offsets = [0, 48], sizes = [8, 16], strides = [1, 1]} : vector<8x64xf32> to vector<8x16xf32>
    %64 = vector.extract_strided_slice %11 {offsets = [0, 48], sizes = [8, 16], strides = [1, 1]} : vector<8x64xf32> to vector<8x16xf32>
    %65 = vector.extract_strided_slice %17 {offsets = [0, 48], sizes = [8, 16], strides = [1, 1]} : vector<8x64xf32> to vector<8x16xf32>
    %cst_31 = arith.constant dense<0.000000e+00> : vector<8x8xf32>
    %66 = tpu.matmul %63, %64, %cst_31 {dimension_numbers = #tpu.dot_dimension_numbers<[1], [1], [0], [0], [0, 0, 1, 0], [], []>} : vector<8x16xf32>, vector<8x16xf32>, vector<8x8xf32> -> vector<8x8xf32>
    %cst_32 = arith.constant dense<0xFF800000> : vector<8xf32>
    %67 = vector.multi_reduction <maximumf>, %66, %cst_32 [1] : vector<8x8xf32> to vector<8xf32>
    %68 = vector.shape_cast %67 : vector<8xf32> to vector<8x1xf32>
    %69 = vector.broadcast %68 : vector<8x1xf32> to vector<8x8xf32>
    %70 = arith.subf %66, %69 : vector<8x8xf32>
    %71 = math.exp %70 : vector<8x8xf32>
    %cst_33 = arith.constant dense<0.000000e+00> : vector<8xf32>
    %72 = vector.multi_reduction <add>, %71, %cst_33 [1] : vector<8x8xf32> to vector<8xf32>
    %73 = vector.shape_cast %72 : vector<8xf32> to vector<8x1xf32>
    %74 = tpu.reciprocal %73 {approx = true} : vector<8x1xf32> -> vector<8x1xf32>
    %75 = vector.broadcast %74 : vector<8x1xf32> to vector<8x8xf32>
    %76 = arith.mulf %71, %75 : vector<8x8xf32>
    %cst_34 = arith.constant dense<0.000000e+00> : vector<8x16xf32>
    %77 = tpu.matmul %76, %65, %cst_34 {dimension_numbers = #tpu.dot_dimension_numbers<[1], [0], [0], [1], [0, 0, 1, 1], [], []>} : vector<8x8xf32>, vector<8x16xf32>, vector<8x16xf32> -> vector<8x16xf32>
    %78 = tpu.concatenate %32, %47, %62, %77 in 1 : vector<8x16xf32>, vector<8x16xf32>, vector<8x16xf32>, vector<8x16xf32> -> vector<8x64xf32>
    %c0_35 = arith.constant 0 : index
    %c0_36 = arith.constant 0 : index
    %79 = vector.load %arg10[%c0_35, %c0_36] : memref<64x32xf32, #tpu.memory_space<vmem>>, vector<64x32xf32>
    %cst_37 = arith.constant dense<0.000000e+00> : vector<8x32xf32>
    %80 = tpu.matmul %78, %79, %cst_37 {dimension_numbers = #tpu.dot_dimension_numbers<[1], [0], [0], [1], [0, 0, 1, 1], [], []>} : vector<8x64xf32>, vector<64x32xf32>, vector<8x32xf32> -> vector<8x32xf32>
    %c0_38 = arith.constant 0 : index
    %c0_39 = arith.constant 0 : index
    %81 = vector.load %arg11[%c0_38, %c0_39] : memref<1x32xf32, #tpu.memory_space<vmem>>, vector<1x32xf32>
    %82 = vector.broadcast %81 : vector<1x32xf32> to vector<8x32xf32>
    %83 = arith.addf %80, %82 : vector<8x32xf32>
    %c0_40 = arith.constant 0 : index
    %c0_41 = arith.constant 0 : index
    %84 = vector.load %arg12[%c0_40, %c0_41] : memref<8x32xf32, #tpu.memory_space<vmem>>, vector<8x32xf32>
    tpu.vector_store %arg12[%c0_40, %c0_41], %83 {strides = array<i32>} : memref<8x32xf32, #tpu.memory_space<vmem>>, vector<8x32xf32>,
    return
  }
  func.func @transform_0(%arg0: i32) -> (i32, i32) {
    %c0_i32 = arith.constant 0 : i32
    %c0_i32_0 = arith.constant 0 : i32
    return %arg0, %c0_i32 : i32, i32
  }
  func.func @transform_1(%arg0: i32) -> (i32, i32) {
    %c0_i32 = arith.constant 0 : i32
    %c0_i32_0 = arith.constant 0 : i32
    return %arg0, %c0_i32 : i32, i32
  }
  func.func @transform_2(%arg0: i32) -> (i32, i32) {
    %c0_i32 = arith.constant 0 : i32
    %c0_i32_0 = arith.constant 0 : i32
    return %arg0, %c0_i32 : i32, i32
  }
  func.func @transform_3(%arg0: i32) -> (i32, i32) {
    %c0_i32 = arith.constant 0 : i32
    %c0_i32_0 = arith.constant 0 : i32
    %c0_i32_1 = arith.constant 0 : i32
    return %c0_i32, %c0_i32_0 : i32, i32
  }
  func.func @transform_4(%arg0: i32) -> (i32, i32) {
    %c0_i32 = arith.constant 0 : i32
    %c0_i32_0 = arith.constant 0 : i32
    %c0_i32_1 = arith.constant 0 : i32
    return %c0_i32, %c0_i32_0 : i32, i32
  }
  func.func @transform_5(%arg0: i32) -> (i32, i32) {
    %c0_i32 = arith.constant 0 : i32
    %c0_i32_0 = arith.constant 0 : i32
    %c0_i32_1 = arith.constant 0 : i32
    return %c0_i32, %c0_i32_0 : i32, i32
  }
  func.func @transform_6(%arg0: i32) -> (i32, i32) {
    %c0_i32 = arith.constant 0 : i32
    %c0_i32_0 = arith.constant 0 : i32
    %c0_i32_1 = arith.constant 0 : i32
    return %c0_i32, %c0_i32_0 : i32, i32
  }
  func.func @transform_7(%arg0: i32) -> (i32, i32) {
    %c0_i32 = arith.constant 0 : i32
    %c0_i32_0 = arith.constant 0 : i32
    %c0_i32_1 = arith.constant 0 : i32
    return %c0_i32, %c0_i32_0 : i32, i32
  }
  func.func @transform_8(%arg0: i32) -> (i32, i32) {
    %c0_i32 = arith.constant 0 : i32
    %c0_i32_0 = arith.constant 0 : i32
    %c0_i32_1 = arith.constant 0 : i32
    return %c0_i32, %c0_i32_0 : i32, i32
  }
  func.func @transform_9(%arg0: i32) -> (i32, i32) {
    %c0_i32 = arith.constant 0 : i32
    %c0_i32_0 = arith.constant 0 : i32
    %c0_i32_1 = arith.constant 0 : i32
    return %c0_i32, %c0_i32_0 : i32, i32
  }
  func.func @transform_10(%arg0: i32) -> (i32, i32) {
    %c0_i32 = arith.constant 0 : i32
    %c0_i32_0 = arith.constant 0 : i32
    %c0_i32_1 = arith.constant 0 : i32
    return %c0_i32, %c0_i32_0 : i32, i32
  }
  func.func @transform_11(%arg0: i32) -> (i32, i32) {
    %c0_i32 = arith.constant 0 : i32
    %c0_i32_0 = arith.constant 0 : i32
    return %arg0, %c0_i32 : i32, i32
  }
}

</mosaic_0001>

<bundles_post_ra>
// kernel: tpu_custom_call.1
= control target key start
LH: loop header
LB: loop body
LE: loop exit
PB: predicated region body
PF: predicated region fallthrough
CT: control target
= control target key end

     0   :  { %s2638_s0 = inlined_call_operand.hbm [shape: f32[16,32], index: 0, kind: input, shape index: {}]   ;;  %s2639_s1 = inlined_call_operand.hbm [shape: f32[16,32], index: 1, kind: input, shape index: {}]   ;;  %s2640_s2 = inlined_call_operand.hbm [shape: f32[16,32], index: 2, kind: input, shape index: {}]   ;;  %s2641_s3 = inlined_call_operand.vmem [shape: f32[32,64], index: 3, kind: input, shape index: {}]   ;;  %s2642_s4 = inlined_call_operand.vmem [shape: f32[1,64], index: 4, kind: input, shape index: {}]   ;;  %s2643_s5 = inlined_call_operand.vmem [shape: f32[32,64], index: 5, kind: input, shape index: {}]   ;;  %s2644_s6 = inlined_call_operand.vmem [shape: f32[1,64], index: 6, kind: input, shape index: {}]   ;;  %s2645_s7 = inlined_call_operand.vmem [shape: f32[32,64], index: 7, kind: input, shape index: {}]   ;;  %s2646_s8 = inlined_call_operand.hbm [shape: f32[1,64], index: 8, kind: input, shape index: {}]   ;;  %s2647_s9 = inlined_call_operand.vmem [shape: f32[64,32], index: 9, kind: input, shape index: {}]   ;;  %s2648_s10 = inlined_call_operand.vmem [shape: f32[1,32], index: 10, kind: input, shape index: {}]   ;;  %s2649_s11 = inlined_call_operand.hbm [shape: f32[16,32], index: 11, kind: output, shape index: {}]  }
   0x1   :  { %2669 = sst [smem:[#allocation22_spill]] %s2638_s0 }
   0x2   :  { %2670 = sst [smem:[#allocation23_spill]] %s2639_s1 }
   0x3   :  { %2671 = sst [smem:[#allocation24_spill]] %s2647_s9 }
   0x4   :  { %2672 = sst [smem:[#allocation25_spill]] %s2648_s10 }
   0x5   :  { %2673 = sst [smem:[#allocation26_spill]] %s2649_s11 }
   0x6   :  { %16 = vsyncpa [#allocation3], 0 }
   0x7   :  { %18 = vsyncpa [#allocation3 + $0x1], 0 }
   0x8   :  { %19 = vsyncpa [#allocation6], 0 }
   0x9   :  { %21 = vsyncpa [#allocation6 + $0x1], 0 }
   0xa   :  { %22 = vsyncpa [#allocation9], 0 }
   0xb   :  { %23 = vsyncpa [#allocation4], 0 }
   0xc   :  { %25 = vsyncpa [#allocation4 + $0x1], 0  ;;  %s2205_s17 = smov 0   ;;  %s2207_s18 = smov 0  }
   0xd   :  { %s2209_s19 = smov 0   ;;  %s2211_s20 = smov 0  }
   0xe LB: > { %2674 = sst [smem:[#allocation15_spill]] %s2117_s17  ;;  %s2226_s21 = sadd.s32 1, %s2129_s20   ;;  %s2129_s20 = sphi %s2211_s20, %s2709_s20   ;;  %s2125_s19 = sphi %s2209_s19, %s2711_s19   ;;  %s2121_s18 = sphi %s2207_s18, %s2713_s18   ;;  %s2117_s17 = sphi %s2205_s17, %s2712_s17  }
   0xf   : > { %2675 = sst [smem:[#allocation16_spill]] %s2125_s19  ;;  %s38_s22 = sadd.s32 1, %s2125_s19 }
  0x10   : > { %2676 = sst [smem:[#allocation17_spill]] %s2129_s20  ;;  %s35_s23 = ssub.s32 %s2129_s20, %s2226_s21 }
  0x11   : > { %2677 = sst [smem:[#allocation18_spill]] %s2226_s21  ;;  %p2651_p0 = scmp.ne.s32.totalorder %s2125_s19, %s2121_s18 }
  0x12   : > { %p36_p1 = scmp.eq.s32.totalorder %s35_s23, 0  ;;  %p46_p2 = scmp.eq.s32.totalorder %s2129_s20, 0 }
  0x13   : > { %p1876_p4 = scmp.lt.s32.totalorder %s2129_s20, 2  ;;  %s2650_s25 = sand.u32 1, %s2125_s19  }
  0x14   : > { %s2237_s24 = scalar_select %p36_p1, %s2125_s19, %s38_s22  }
  0x15   : > { %p47_p5 = por %p46_p2, %p2651_p0  ;;  %s2245_s26 = sshll.u32 %s2650_s25, 3 }
  0x16   : > { %2678 = sst [smem:[#allocation19_spill]] %s2237_s24  ;;  %s2248_s27 = sshll.u32 %s2129_s20, 7 }
  0x17   : > { %p2250_p6 = pnand %p1876_p4, %p47_p5  ;;  %s371_s29 = sand.u32 1, %s2129_s20  }
  0x18   : > { %s2680_s1 = sld [smem:[#allocation23_spill]]  ;;  %s375_s14 = scalar_lea.vmem [#allocation5], %s2245_s26 }
  0x19   : > { %s2679_s28 = scalar_select %p2250_p6, 1, 0 }
  0x1a   : > { %s382_s15 = sshll.u32 %s375_s14, 4  ;;  %s2264_s16 = scalar_lea.sflag [#allocation6], %s371_s29  ;;  %s2262_s15 = int_to_ptr.vmem [resolvable:$true] %s382_s15 }
  0x1b   : > { %p2270_p8 = pneg %p2250_p6 }
  0x1e   : > { %s2259_s13 = scalar_lea.hbm %s2680_s1, %s2248_s27  ;;  %s1942_s25 = scalar_lea.hbm %s2680_s1, 256 }
  0x1f   : > { %s1937_s22 = scalar_lea.hbm %s2259_s13, 128  ;;  %p1943_p11 = scmp.lt.u32.totalorder %s2259_s13, %s2680_s1 }
  0x20   : > { %p1938_p7 = scmp.ne.s32.totalorder %s2259_s13, %s1937_s22  ;;  %p1944_p12 = scmp.lt.u32.totalorder %s1942_s25, %s1937_s22 }
  0x21   : > { %p1946_p1 = scmp.lt.u32.totalorder %s1937_s22, %s2259_s13 }
  0x22   : > { %p1940_p9 = pnand %p2270_p8, %p1938_p7  ;;  %p1945_p13 = por %p1944_p12, %p1943_p11 }
  0x24   : > { %p1941_p10 = pneg %p1940_p9  ;;  %p1947_p2 = por %p1946_p1, %p1945_p13 }
  0x26   : > { %p1948_p4 = pnand %p1947_p2, %p1941_p10 }
  0x28   : > { %1951 = shalt.err (!%p1948_p4)
}
  0x29   : > { %s1952_s29 = scalar_lea.vmem %s2262_s15, 128  ;;  %s2131_s30 = smov [#allocation5]  }
  0x2a   : > { %p1953_p5 = scmp.ne.s32.totalorder %s2262_s15, %s1952_s29  ;;  %s1957_s12 = sshll.u32 %s2131_s30, 4  ;;  %s1958_s12 = int_to_ptr.vmem [resolvable:$false] %s1957_s12 }
  0x2b   : > { %s1959_s24 = scalar_lea.vmem %s1958_s12, 256  ;;  %p1960_p3 = scmp.lt.s32.totalorder %s2262_s15, %s1958_s12 }
  0x2c   : > { %p1955_p7 = pnand %p1953_p5, %p2270_p8  ;;  %p1961_p0 = scmp.lt.s32.totalorder %s1959_s24, %s1952_s29 }
  0x2e   : > { %p1956_p9 = pneg %p1955_p7  ;;  %p1962_p11 = por %p1961_p0, %p1960_p3 }
  0x30   : > { %p1963_p12 = pnand %p1962_p11, %p1956_p9 }
  0x32   : > { %1966 = shalt.err (!%p1963_p12)
}
  0x33   : > { %1867 = dma.hbm_to_vmem [thread:$0]  (!%p2250_p6), %s2259_s13, 128, %s2262_s15, %s2264_s16  }
  0x34   : > { %s2295_s25 = sadd.s32 4294967295, %s2129_s20   ;;  %s1643_s22 = sadd.s32 4294967294, %s2129_s20  }
  0x35   : > { %p51_p0 = scmp.ne.s32.totalorder %s2121_s18, %s2117_s17  ;;  %p2661_p3 = scmp.eq.s32.totalorder %s2295_s25, 0 }
  0x36   : > { %p295_p10 = scmp.eq.s32.totalorder %s2295_s25, 1  ;;  %p301_p13 = scmp.eq.s32.totalorder %s1643_s22, 1 }
  0x37   : > { %p2304_p1 = por %p2661_p3, %p51_p0  ;;  %p1644_p2 = scmp.ge.s32.totalorder %s2129_s20, 1 }
  0x38   : > { %p2683_p4 = scmp.ne.s32.totalorder %s2125_s19, %s2121_s18  ;;  %p2316_p7 = por %p301_p13, %p51_p0 }
  0x39   : > { %s2682_s14 = scalar_select %p2304_p1, 1, 0 }
  0x3a   : > { %p2312_p5 = por %p295_p10, %p2683_p4  ;;  %p308_p9 = scmp.lt.s32.totalorder %s2129_s20, 3 }
  0x3b   : > { %s2686_s15 = scalar_select %p2316_p7, 1, 0 }
  0x3c   : > { %s2684_s13 = scalar_select %p2312_p5, 1, 0 }
  0x3d   : > { %2687 = sst [smem:[#allocation21_spill]] %s2686_s15  ;;  %p2321_p11 = pnand %p1644_p2, %p308_p9 }
  0x3e   : > { %2685 = sst [smem:[#allocation20_spill]] %s2684_s13  ;;  %s2132_s30 = smov [#allocation8]  }
  0x3f   : > { %s2688_s29 = scalar_select %p2321_p11, 1, 0 }
  0x40   : > { %s336_s12 = sshll.u32 %s2132_s30, 4  ;;  %p1857_p12 = pneg %p2321_p11  ;;  %s2325_s12 = int_to_ptr.vmem [resolvable:$true] %s336_s12 }
  0x41   : > { %s2689_s0 = sld [smem:[#allocation22_spill]]  ;;  %s357_s21 = scalar_lea.vmem [#allocation2], %s2245_s26 }
  0x42   : > { %s364_s20 = sshll.u32 %s357_s21, 4  ;;  %p2338_p0 = pnand %p1857_p12, %p2661_p3  ;;  %s365_s20 = int_to_ptr.vmem [resolvable:$true] %s364_s20 }
  0x43   : > { %s2691_s30 = sand.u32 1, %s2125_s19  }
  0x44   : > { %s2690_s15 = scalar_select %p2338_p0, 1, 0 }
  0x45   : > { %s354_s17 = scalar_lea.sflag [#allocation3], %s2691_s30 }
  0x47   : > { %s2333_s1 = scalar_lea.hbm %s2689_s0, %s2248_s27  ;;  %s1972_s10 = scalar_lea.hbm %s2689_s0, 256 }
  0x48   : > { %s1967_s11 = scalar_lea.hbm %s2333_s1, 128  ;;  %p1973_p4 = scmp.lt.u32.totalorder %s2333_s1, %s2689_s0 }
  0x49   : > { %p1968_p10 = scmp.ne.s32.totalorder %s2333_s1, %s1967_s11  ;;  %p1974_p9 = scmp.lt.u32.totalorder %s1972_s10, %s1967_s11 }
  0x4a   : > { %p1976_p3 = scmp.lt.u32.totalorder %s1967_s11, %s2333_s1 }
  0x4b   : > { %p1970_p13 = pnand %p1968_p10, %p2270_p8  ;;  %p1975_p12 = por %p1974_p9, %p1973_p4 }
  0x4d   : > { %p1971_p2 = pneg %p1970_p13  ;;  %p1977_p7 = por %p1976_p3, %p1975_p12 }
  0x4f   : > { %p1978_p5 = pnand %p1977_p7, %p1971_p2 }
  0x51   : > { %1981 = shalt.err (!%p1978_p5)
}
  0x52   : > { %s1982_s21 = scalar_lea.vmem %s365_s20, 128  ;;  %s2133_s30 = smov [#allocation2]  }
  0x53   : > { %p1983_p1 = scmp.ne.s32.totalorder %s365_s20, %s1982_s21  ;;  %s1987_s19 = sshll.u32 %s2133_s30, 4  ;;  %s1988_s19 = int_to_ptr.vmem [resolvable:$false] %s1987_s19 }
  0x54   : > { %s1989_s24 = scalar_lea.vmem %s1988_s19, 256  ;;  %p1990_p11 = scmp.lt.s32.totalorder %s365_s20, %s1988_s19 }
  0x55   : > { %p1985_p10 = pnand %p1983_p1, %p2270_p8  ;;  %p1991_p0 = scmp.lt.s32.totalorder %s1989_s24, %s1982_s21 }
  0x57   : > { %p1986_p13 = pneg %p1985_p10  ;;  %p1992_p6 = por %p1991_p0, %p1990_p11 }
  0x59   : > { %p1993_p4 = pnand %p1992_p6, %p1986_p13 }
  0x5b   : > { %1996 = shalt.err (!%p1993_p4)
}
  0x5c   : > { %p2692_p9 = scmp.ne.s32.totalorder %s2679_s28, 0  ;;  %s2365_s11 = scalar_lea.hbm %s2640_s2, %s2248_s27 }
  0x5d   : > { %s1997_s30 = scalar_lea.hbm %s2646_s8, 16  ;;  %p2693_p3 = scmp.ne.s32.totalorder %s2690_s15, 0 }
  0x5e   : > { %1864 = dma.hbm_to_vmem [thread:$0]  (!%p2692_p9), %s2333_s1, 128, %s365_s20, %s354_s17  }
  0x5f   : > { %p1998_p6 = scmp.ne.s32.totalorder %s2646_s8, %s1997_s30  ;;  %p1999_p1 = pneg %p2693_p3 }
  0x60   : > { %p2004_p11 = scmp.lt.u32.totalorder %s1997_s30, %s2646_s8 }
  0x61   : > { %p2000_p5 = pnand %p1999_p1, %p1998_p6 }
  0x63   : > { %p2001_p7 = pneg %p2000_p5 }
  0x65   : > { %p2006_p0 = pnand %p2004_p11, %p2001_p7 }
  0x67   : > { %2009 = shalt.err (!%p2006_p0)
}
  0x68   : > { %s2010_s1 = scalar_lea.vmem %s2325_s12, 16  ;;  %s2017_s17 = scalar_lea.vmem %s2325_s12, 32 }
  0x69   : > { %p2011_p2 = scmp.ne.s32.totalorder %s2325_s12, %s2010_s1  ;;  %p2018_p13 = scmp.lt.s32.totalorder %s2325_s12, %s2325_s12 }
  0x6a   : > { %p2019_p4 = scmp.lt.s32.totalorder %s2017_s17, %s2010_s1 }
  0x6b   : > { %p2013_p12 = pnand %p2011_p2, %p1999_p1 }
  0x6c   : > { %p2020_p6 = por %p2019_p4, %p2018_p13 }
  0x6d   : > { %p2014_p10 = pneg %p2013_p12 }
  0x6f   : > { %p2021_p5 = pnand %p2020_p6, %p2014_p10 }
  0x71   : > { %2024 = shalt.err (!%p2021_p5)
}
  0x72   : > { %1860 = dma.hbm_to_vmem [thread:$0]  (!%p2693_p3), %s2646_s8, 16, %s2325_s12, [#allocation9]  }
  0x73   : > { %s393_s27 = scalar_lea.vmem [#allocation7], %s2245_s26  ;;  %s2025_s10 = scalar_lea.hbm %s2365_s11, 128 }
  0x74   : > { %s400_s9 = sshll.u32 %s393_s27, 4  ;;  %p2026_p1 = scmp.ne.s32.totalorder %s2365_s11, %s2025_s10  ;;  %s401_s9 = int_to_ptr.vmem [resolvable:$true] %s400_s9 }
  0x75   : > { %s2030_s22 = scalar_lea.hbm %s2640_s2, 256  ;;  %p2031_p0 = scmp.lt.u32.totalorder %s2365_s11, %s2640_s2 }
  0x76   : > { %p2028_p7 = pnand %p2026_p1, %p2270_p8  ;;  %p2032_p2 = scmp.lt.u32.totalorder %s2030_s22, %s2025_s10 }
  0x77   : > { %p2034_p10 = scmp.lt.u32.totalorder %s2025_s10, %s2365_s11 }
  0x78   : > { %p2029_p11 = pneg %p2028_p7  ;;  %p2033_p12 = por %p2032_p2, %p2031_p0 }
  0x7a   : > { %p2035_p3 = por %p2034_p10, %p2033_p12 }
  0x7c   : > { %p2036_p13 = pnand %p2035_p3, %p2029_p11 }
  0x7e   : > { %2039 = shalt.err (!%p2036_p13)
}
  0x7f   : > { %s2040_s26 = scalar_lea.vmem %s401_s9, 128  ;;  %s2134_s12 = smov [#allocation7]  }
  0x80   : > { %p2041_p4 = scmp.ne.s32.totalorder %s401_s9, %s2040_s26  ;;  %s2045_s21 = sshll.u32 %s2134_s12, 4  ;;  %s2046_s21 = int_to_ptr.vmem [resolvable:$false] %s2045_s21 }
  0x81   : > { %s2047_s24 = scalar_lea.vmem %s2046_s21, 256  ;;  %p2048_p1 = scmp.lt.s32.totalorder %s401_s9, %s2046_s21 }
  0x82   : > { %p2043_p6 = pnand %p2041_p4, %p2270_p8  ;;  %p2049_p7 = scmp.lt.s32.totalorder %s2047_s24, %s2040_s26 }
  0x84   : > { %p2044_p5 = pneg %p2043_p6  ;;  %p2050_p9 = por %p2049_p7, %p2048_p1 }
  0x86   : > { %p2051_p0 = pnand %p2050_p9, %p2044_p5 }
  0x88   : > { %2054 = shalt.err (!%p2051_p0)
}
  0x89   : > { %p2694_p2 = scmp.ne.s32.totalorder %s2679_s28, 0  ;;  %p2695_p11 = scmp.ne.s32.totalorder %s2688_s29, 0 }
  0x8a   : > { %s2411_s23 = sand.u32 (!%p2695_p11), 1, %s2121_s18   ;;  %p2696_p8 = scmp.ne.s32.totalorder (!%p2695_p11), %s2682_s14, 0 }
  0x8b   : > { %1870 = dma.hbm_to_vmem [thread:$0]  (!%p2694_p2), %s2365_s11, 128, %s401_s9, %s2264_s16  }
  0x8c   : > { %409 = sbr.rel (%p2695_p11) target bundleno = 1596 (0x63c), region = 64  ;;  %s2414_s1 = sshll.u32 (!%p2695_p11), %s2411_s23, 3 }
  0x8d   : > { %s412_s17 = scalar_lea.sflag (!%p2695_p11), [#allocation3], %s2411_s23  ;;  %s415_s0 = scalar_lea.vmem (!%p2695_p11), [#allocation2], %s2414_s1 }
  0x93   : > { %2100 = dma.done.wait (%p2696_p8), %s412_s17, 128  }
  0x94   : > { %2102 = vsyncadd (%p2696_p8), %s412_s17, 4294967168  ;;  %s420_s28 = sand.u32 1, %s2295_s25   ;;  %s424_s29 = scalar_lea.vmem [#allocation5], %s2414_s1 }
  0x95   : > { %s421_s16 = scalar_lea.sflag [#allocation6], %s420_s28 }
  0x96   : > { %2104 = dma.done.wait (%p2696_p8), %s421_s16, 256  }
  0x97   : > { %2106 = vsyncadd (%p2696_p8), %s421_s16, 4294967040  ;;  %s433_s11 = scalar_lea.vmem [#allocation7], %s2414_s1  ;;  %p2697_p9 = scmp.eq.s32.totalorder %s2295_s25, 0 }
  0x99   : > { %2108 = dma.done.wait (%p2697_p9), [#allocation9], 16   ;;  %p2698_p12 = pmov %p2697_p9 }
  0x9a   : > { %v2135_v0 = vmov 0.0|0.0   ;;  %vm2136_vm0 = vmmov 0   ;;  %v2137_v1 = vmov 0.0   ;;  %v487_v2 = vld [vmem:[%s2641_s3] sm:$0xff]  ;;  %v488_v3 = vld [vmem:[%s2641_s3 + $0x8] sm:$0xff]  ;;  %v489_v4 = vld [vmem:[%s2641_s3 + $0x10] sm:$0xff] }
  0x9b   : > { %2110 = vsyncadd (%p2698_p12), [#allocation9], 4294967280  ;;  %1815 = vmatprep.subr.bf16.mxu1 %v2135_v0  ;;  %1731 = vmatprep.mubr.msk.f32.mxu1 %vm2136_vm0, %v2137_v1  ;;  %v1816_v5 = vpack.c.bf16 %v488_v3, %v487_v2  ;;  %v490_v6 = vld [vmem:[%s2641_s3 + $0x18] sm:$0xff]  ;;  %v573_v8 = vld [vmem:[%s2643_s5] sm:$0xff]  ;;  %vm498_vm1 = vcmask 261120   ;;  %vm742_vm2 = vcmask 130048  }
  0x9c   : > { %1827 = vmatprep.subr.bf16.mxu0 %v2135_v0  ;;  %1753 = vmatprep.mubr.msk.f32.mxu0 %vm2136_vm0, %v2137_v1  ;;  %v1819_v7 = vpack.c.bf16 %v490_v6, %v489_v4  ;;  %v574_v9 = vld [vmem:[%s2643_s5 + $0x8] sm:$0xff]  ;;  %v575_v12 = vld [vmem:[%s2643_s5 + $0x10] sm:$0xff]  ;;  %v576_v13 = vld [vmem:[%s2643_s5 + $0x18] sm:$0xff]  ;;  %s2139_s19 = smov 112   ;;  %s2140_s26 = smov 80   ;;  %vm819_vm3 = vcmask 64512  }
  0x9d   : > { %1817 = vmatpush3.bf16.msra.mxu1 %v1816_v5  ;;  %v486_v10 = vld [vmem:[%s415_s0] sm:$0xff]  ;;  %v1822_v11 = vpack.c.bf16 %v574_v9, %v573_v8  ;;  %v1825_v14 = vpack.c.bf16 %v576_v13, %v575_v12  ;;  %v572_v15 = vld [vmem:[%s424_s29] sm:$0xff]  ;;  %s2699_s24 = sld [smem:[#allocation24_spill]]  ;;  %vm1414_vm4 = vcmask 392192   ;;  %vm1431_vm5 = vcmask 523264   ;;  %s2701_s28 = sld [smem:[#allocation25_spill]] }
  0x9e   : > { %1818 = vmatprep.subr.bf16.mxu1 %v2135_v0  ;;  %v658_v16 = vld [vmem:[%s2645_s7] sm:$0xff]  ;;  %v659_v17 = vld [vmem:[%s2645_s7 + $0x8] sm:$0xff]  ;;  %v660_v18 = vld [vmem:[%s2645_s7 + $0x10] sm:$0xff]  ;;  %s2700_s12 = sld [smem:[#allocation20_spill]]  ;;  %s1680_s0 = sshll.u32 %s2295_s25, 7 }
  0x9f   : > { %v1828_v19 = vpack.c.bf16 %v659_v17, %v658_v16  ;;  %v661_v20 = vld [vmem:[%s2645_s7 + $0x18] sm:$0xff]  ;;  %v657_v22 = vld [vmem:[%s433_s11] sm:$0xff]  ;;  %s2138_s11 = smov 96   ;;  %v1663_v31 = vld [vmem:[#allocation8] ss:$0 sm:$0xff]  ;;  %s485_s16 = scalar_lea.vmem [#allocation10], %s2414_s1 }
  0xa0   : > { %v1831_v21 = vpack.c.bf16 %v661_v20, %v660_v18  ;;  %v1661_v25 = vld [vmem:[%s2644_s6] ss:$0 sm:$0xff]  ;;  %s1520_s14 = sshll.u32 %s485_s16, 4  ;;  %s2702_s9 = sld [smem:[#allocation26_spill]]  ;;  %s2595_s14 = int_to_ptr.vmem [resolvable:$true] %s1520_s14 }
  0xa1   : > { %1820 = vmatpush3.bf16.msra.mxu1 %v1819_v7  ;;  %1829 = vmatpush3.bf16.msra.mxu0 %v1828_v19  ;;  %v1659_v29 = vld [vmem:[%s2642_s4] ss:$0 sm:$0xff]  ;;  %s1507_s10 = scalar_lea.sflag [#allocation4], %s2411_s23  ;;  %s2055_s15 = scalar_lea.vmem %s2595_s14, 128 }
  0xa2   : > { %1821 = vmatprep.subr.bf16.mxu1 %v2135_v0  ;;  %1830 = vmatprep.subr.bf16.mxu0 %v2135_v0  ;;  %p2056_p10 = scmp.ne.s32.totalorder %s2595_s14, %s2055_s15  ;;  %s2144_s25 = smov [#allocation10]  }
  0xa3   : > { %s2059_s1 = sshll.u32 %s2144_s25, 4  ;;  %s2060_s1 = int_to_ptr.vmem [resolvable:$false] %s2059_s1 }
  0xa4   : > { %1732 = vmatmul.mubr.msk.f32.vlgmr.msra.gmra.mrb[0].mxu1 %vm498_vm1, %v486_v10  ;;  %p2703_p3 = scmp.ne.s32.totalorder %s2700_s12, 0  ;;  %s2061_s13 = scalar_lea.vmem %s2060_s1, 256 }
  0xa5   : > { %1823 = vmatpush3.bf16.msra.mxu1 %v1822_v11  ;;  %1742 = vmatprep.mubr.msk.f32.mxu1 %vm2136_vm0, %v2137_v1  ;;  %p2062_p6 = scmp.lt.s32.totalorder %s2595_s14, %s2060_s1  ;;  %p2063_p5 = scmp.lt.s32.totalorder %s2061_s13, %s2055_s15 }
  0xa6   : > { %1824 = vmatprep.subr.bf16.mxu1 %v2135_v0  ;;  %1832 = vmatpush3.bf16.msra.mxu0 %v1831_v21  ;;  %s2593_s29 = scalar_lea.hbm %s2702_s9, %s1680_s0  ;;  %p2057_p13 = pnand %p2056_p10, %p2703_p3 }
  0xa7   : > { %1766 = vmatprep.subr.mxu0 %v2137_v1  ;;  %p2064_p1 = por %p2063_p5, %p2062_p6 }
  0xa8   : > { %p2058_p4 = pneg %p2057_p13 }
  0xa9   : > { %1826 = vmatpush3.bf16.msra.mxu1 %v1825_v14  ;;  %1754 = vmatmul.mubr.msk.f32.vlgmr.msra.gmra.mrb[0].mxu0 %vm498_vm1, %v657_v22 }
  0xaa   : > { %1756 = vmatprep.subr.mxu1 %v2137_v1  ;;  %1768 = vmatprep.mubr.msk.f32.mxu0 %vm2136_vm0, %v2137_v1  ;;  %p2065_p7 = pnand %p2064_p1, %p2058_p4 }
  0xac   : > { %1743 = vmatmul.mubr.msk.f32.vlgmr.msra.gmra.mrb[2].mxu1 %vm498_vm1, %v572_v15 }
  0xad   : > { %1758 = vmatprep.mubr.msk.f32.mxu1 %vm2136_vm0, %v2137_v1 }
 0x177   : > { %v568_v23 = vpop.f32.mrb[0].mxu1 }
 0x178   : > { %v1733_v24 = vpop.f32.mrb[1].mxu1  ;;  %v569_v30 = vadd.f32 %v1659_v29, %v568_v23 }
 0x17c   : > { %v738_v32 = vpop.f32.mrb[0].mxu0 }
 0x17d   : > { %v2511_v33 = vadd.f32 %v1663_v31, %v738_v32  ;;  %v1755_v34 = vpop.f32.mrb[1].mxu0 }
 0x17e   : > { %v1421_v34 = vld [vmem:[%s2699_s24 + $0x28] sm:$0xff] }
 0x17f   : > { %v653_v26 = vpop.f32.mrb[2].mxu1 }
 0x180   : > { %v654_v27 = vadd.f32 %v1661_v25, %v653_v26  ;;  %v1744_v28 = vpop.f32.mrb[3].mxu1  ;;  %v1416_v26 = vld [vmem:[%s2699_s24] sm:$0xff] }
 0x181   : > { %v1418_v28 = vld [vmem:[%s2699_s24 + $0x10] sm:$0xff] }
 0x182   : > { %1072 = vrot.lane.b32.xlu1 %v654_v27, %s2138_s11  ;;  %906 = vrot.lane.b32.xlu0 %v654_v27, %s2139_s19 }
 0x183   : > { %1757 = vmatpush3.xpose.msk.msra.mxu1 %vm742_vm2, %v654_v27 }
 0x184   : > { %1761 = vmatprep.subr.mxu1 %v2137_v1 }
 0x186   : > { %1759 = vmatmul.mubr.msk.f32.vlgmr.msra.gmra.mrb[4].mxu1 %vm742_vm2, %v569_v30  ;;  %1070 = vrot.lane.b32.xlu1 %v569_v30, %s2138_s11 }
 0x187   : > { %904 = vrot.lane.b32.xlu0 %v569_v30, %s2139_s19  ;;  %1763 = vmatprep.mubr.msk.f32.mxu1 %vm2136_vm0, %v2137_v1 }
 0x188   : > { %1762 = vmatpush3.msra.mxu1 %v2511_v33 }
 0x189   : > { %1771 = vmatprep.subr.mxu1 %v2137_v1 }
 0x18a   : > { %1235 = vrot.lane.b32.xlu1 %v569_v30, %s2140_s26 }
 0x18b   : > { %1237 = vrot.lane.b32.xlu0 %v654_v27, %s2140_s26  ;;  %v1417_v27 = vld [vmem:[%s2699_s24 + $0x8] sm:$0xff] }
 0x18c   : > { %v1834_v29 = vpack.c.bf16 %v1417_v27, %v1416_v26 }
 0x1f4   : > { %v907_v35 = vpop.permute.xlu0 %906  ;;  %v1073_v36 = vpop.permute.xlu1 %1072 }
 0x1f5   : > { %1767 = vmatpush3.xpose.msk.msra.mxu0 %vm742_vm2, %v907_v35 }
 0x1f6   : > { %1776 = vmatprep.subr.mxu0 %v2137_v1 }
 0x1f8   : > { %v1071_v38 = vpop.permute.xlu1 %1070 }
 0x1f9   : > { %v905_v37 = vpop.permute.xlu0 %904 }
 0x1fa   : > { %1769 = vmatmul.mubr.msk.f32.vlgmr.msra.gmra.mrb[2].mxu0 %vm742_vm2, %v905_v37  ;;  %v1423_v37 = vld [vmem:[%s2699_s24 + $0x38] sm:$0xff] }
 0x1fb   : > { %1777 = vmatpush3.xpose.msk.msra.mxu0 %vm742_vm2, %v1073_v36  ;;  %1778 = vmatprep.mubr.msk.f32.mxu0 %vm2136_vm0, %v2137_v1  ;;  %v1422_v36 = vld [vmem:[%s2699_s24 + $0x30] sm:$0xff] }
 0x1fc   : > { %1786 = vmatprep.subr.mxu0 %v2137_v1  ;;  %v1236_v40 = vpop.permute.xlu1 %1235 }
 0x1fd   : > { %v1238_v39 = vpop.permute.xlu0 %1237 }
 0x1fe   : > { %1779 = vmatmul.mubr.msk.f32.vlgmr.msra.gmra.mrb[4].mxu0 %vm742_vm2, %v1071_v38  ;;  %v1843_v38 = vpack.c.bf16 %v1423_v37, %v1422_v36 }
 0x1ff   : > { %1787 = vmatpush3.xpose.msk.msra.mxu0 %vm742_vm2, %v1238_v39  ;;  %1788 = vmatprep.mubr.msk.f32.mxu0 %vm2136_vm0, %v2137_v1 }
 0x200   : > { %1833 = vmatprep.subr.bf16.mxu0 %v2135_v0 }
 0x202   : > { %1789 = vmatmul.mubr.msk.f32.vlgmr.msra.gmra.mrb[6].mxu0 %vm742_vm2, %v1236_v40 }
 0x203   : > { %1812 = vmatprep.mubr.msk.f32.mxu0 %vm2136_vm0, %v2137_v1  ;;  %1835 = vmatpush3.bf16.msra.mxu0 %v1834_v29 }
 0x204   : > { %1836 = vmatprep.subr.bf16.mxu0 %v2135_v0 }
 0x259   : > { %v815_v41 = vpop.f32.mrb[4].mxu1 }
 0x25a   : > { %v1760_v42 = vpop.f32.mrb[5].mxu1  ;;  %v820_v43 = vsel %vm819_vm3, %v815_v41, -inf }
 0x25b   : > { %821 = vmax.xlane.f32.xlu0 %v820_v43 }
 0x2cd   : > { %v978_v44 = vpop.f32.mrb[2].mxu0 }
 0x2ce   : > { %v1770_v45 = vpop.f32.mrb[3].mxu0  ;;  %v982_v46 = vsel %vm819_vm3, %v978_v44, -inf }
 0x2cf   : > { %983 = vmax.xlane.f32.xlu1 %v982_v46 }
 0x2d1   : > { %v1144_v47 = vpop.f32.mrb[4].mxu0 }
 0x2d2   : > { %v1780_v48 = vpop.f32.mrb[5].mxu0  ;;  %v1148_v49 = vsel %vm819_vm3, %v1144_v47, -inf }
 0x2d3   : > { %1149 = vmax.xlane.f32.xlu0 %v1148_v49 }
 0x2d5   : > { %v1309_v50 = vpop.f32.mrb[6].mxu0 }
 0x2d6   : > { %v1790_v51 = vpop.f32.mrb[7].mxu0  ;;  %v1313_v52 = vsel %vm819_vm3, %v1309_v50, -inf }
 0x2d7   : > { %1314 = vmax.xlane.f32.xlu0 %v1313_v52 }
 0x2e0   : > { %994 = vrot.lane.b32.xlu1 %v2511_v33, %s2139_s19  ;;  %s2142_s19 = smov 32  }
 0x2e8   : > { %v822_v53 = vpop.xlane.xlu0 %821 }
 0x2e9   : > { %v823_v54 = vsub.f32 %v815_v41, %v822_v53 }
 0x2eb   : > { %v824_v55 = vmul.f32 1.442695, %v823_v54 }
 0x2ed   : > { %1921 = vpow2.f32 %v824_v55 }
 0x2f7   : > { %v1922_v56 = vpop.eup %1921 }
 0x2f8   : > { %v826_v57 = vsel %vm819_vm3, %v1922_v56, 0.0 }
 0x304   : > { %827 = vadd.xlane.f32.xlu1 %v826_v57 }
 0x35c   : > { %v984_v58 = vpop.xlane.xlu1 %983 }
 0x35d   : > { %v985_v59 = vsub.f32 %v978_v44, %v984_v58 }
 0x35f   : > { %v986_v60 = vmul.f32 1.442695, %v985_v59 }
 0x360   : > { %v1150_v61 = vpop.xlane.xlu0 %1149  ;;  %v995_v11 = vpop.permute.xlu1 %994 }
 0x361   : > { %1923 = vpow2.f32 %v986_v60  ;;  %v1151_v62 = vsub.f32 %v1144_v47, %v1150_v61 }
 0x363   : > { %v1152_v63 = vmul.f32 1.442695, %v1151_v62 }
 0x364   : > { %v1315_v2 = vpop.xlane.xlu0 %1314 }
 0x365   : > { %1925 = vpow2.f32 %v1152_v63  ;;  %v1316_v3 = vsub.f32 %v1309_v50, %v1315_v2  ;;  %v1677_v50 = vld [vmem:[%s2701_s28] ss:$0 sm:$0xff] }
 0x367   : > { %v1317_v4 = vmul.f32 1.442695, %v1316_v3 }
 0x369   : > { %1927 = vpow2.f32 %v1317_v4 }
 0x36b   : > { %v1924_v5 = vpop.eup %1923 }
 0x36c   : > { %v988_v6 = vsel %vm819_vm3, %v1924_v5, 0.0 }
 0x36d   : > { %989 = vadd.xlane.f32.xlu0 %v988_v6 }
 0x36f   : > { %v1926_v7 = vpop.eup %1925 }
 0x370   : > { %v1154_v8 = vsel %vm819_vm3, %v1926_v7, 0.0 }
 0x371   : > { %1155 = vadd.xlane.f32.xlu1 %v1154_v8 }
 0x373   : > { %v1928_v9 = vpop.eup %1927 }
 0x374   : > { %v1319_v10 = vsel %vm819_vm3, %v1928_v9, 0.0 }
 0x375   : > { %1320 = vadd.xlane.f32.xlu0 %v1319_v10 }
 0x382   : > { %1324 = vrot.lane.b32.xlu1 %v2511_v33, %s2140_s26  ;;  %s2143_s26 = smov 48  }
 0x38b   : > { %1159 = vrot.lane.b32.xlu0 %v2511_v33, %s2138_s11  ;;  %v1420_v33 = vld [vmem:[%s2699_s24 + $0x20] sm:$0xff]  ;;  %s2141_s11 = smov 16  }
 0x38c   : > { %v1840_v35 = vpack.c.bf16 %v1421_v34, %v1420_v33 }
 0x391   : > { %v828_v12 = vpop.xlane.xlu1 %827 }
 0x392   : > { %1929 = vrcp.f32 %v828_v12 }
 0x39c   : > { %v1930_v13 = vpop.eup %1929 }
 0x39d   : > { %v830_v14 = vmul.f32 %v1930_v13, %v1922_v56 }
 0x39f   : > { %1764 = vmatmul.mubr.msk.f32.vlgmr.msra.gmra.mrb[6].mxu1 %vm819_vm3, %v830_v14 }
 0x3a0   : > { %1772 = vmatpush3.msra.mxu1 %v995_v11  ;;  %1773 = vmatprep.mubr.msk.f32.mxu1 %vm2136_vm0, %v2137_v1 }
 0x3a1   : > { %1781 = vmatprep.subr.mxu1 %v2137_v1 }
 0x3fa   : > { %v990_v15 = vpop.xlane.xlu0 %989 }
 0x3fb   : > { %1931 = vrcp.f32 %v990_v15 }
 0x3fe   : > { %v1156_v16 = vpop.xlane.xlu1 %1155 }
 0x3ff   : > { %1933 = vrcp.f32 %v1156_v16 }
 0x402   : > { %v1321_v17 = vpop.xlane.xlu0 %1320  ;;  %v1325_v23 = vpop.permute.xlu1 %1324 }
 0x403   : > { %1935 = vrcp.f32 %v1321_v17 }
 0x405   : > { %v1932_v18 = vpop.eup %1931 }
 0x406   : > { %v992_v19 = vmul.f32 %v1932_v18, %v1924_v5  ;;  %v1160_v20 = vpop.permute.xlu0 %1159 }
 0x408   : > { %1774 = vmatmul.mubr.msk.f32.vlgmr.msra.gmra.mrb[8].mxu1 %vm819_vm3, %v992_v19 }
 0x409   : > { %v1934_v21 = vpop.eup %1933  ;;  %1782 = vmatpush3.msra.mxu1 %v1160_v20  ;;  %1783 = vmatprep.mubr.msk.f32.mxu1 %vm2136_vm0, %v2137_v1 }
 0x40a   : > { %v1158_v22 = vmul.f32 %v1934_v21, %v1926_v7  ;;  %1791 = vmatprep.subr.mxu1 %v2137_v1 }
 0x40c   : > { %1784 = vmatmul.mubr.msk.f32.vlgmr.msra.gmra.mrb[10].mxu1 %vm819_vm3, %v1158_v22 }
 0x40d   : > { %v1936_v24 = vpop.eup %1935  ;;  %1792 = vmatpush3.msra.mxu1 %v1325_v23  ;;  %1793 = vmatprep.mubr.msk.f32.mxu1 %vm2136_vm0, %v2137_v1  ;;  %v1419_v1 = vld [vmem:[%s2699_s24 + $0x18] sm:$0xff] }
 0x40e   : > { %v1323_v25 = vmul.f32 %v1936_v24, %v1928_v9  ;;  %v1837_v30 = vpack.c.bf16 %v1419_v1, %v1418_v28 }
 0x410   : > { %1794 = vmatmul.mubr.msk.f32.vlgmr.msra.gmra.mrb[12].mxu1 %vm819_vm3, %v1323_v25  ;;  %1838 = vmatpush3.bf16.msra.mxu0 %v1837_v30 }
 0x411   : > { %1839 = vmatprep.subr.bf16.mxu0 %v2135_v0 }
 0x414   : > { %1841 = vmatpush3.bf16.msra.mxu0 %v1840_v35 }
 0x415   : > { %1842 = vmatprep.subr.bf16.mxu0 %v2135_v0 }
 0x418   : > { %1844 = vmatpush3.bf16.msra.mxu0 %v1843_v38 }
 0x472   : > { %v900_v31 = vpop.f32.mrb[6].mxu1 }
 0x473   : > { %v1765_v32 = vpop.f32.mrb[7].mxu1 }
 0x4db   : > { %v1066_v39 = vpop.f32.mrb[8].mxu1 }
 0x4dc   : > { %1401 = vrot.lane.b32.xlu1 %v1066_v39, %s2141_s11  ;;  %v1775_v40 = vpop.f32.mrb[9].mxu1 }
 0x4df   : > { %v1231_v41 = vpop.f32.mrb[10].mxu1 }
 0x4e0   : > { %1405 = vrot.lane.b32.xlu0 %v1231_v41, %s2142_s19  ;;  %v1785_v42 = vpop.f32.mrb[11].mxu1 }
 0x4e3   : > { %v1396_v0 = vpop.f32.mrb[12].mxu1 }
 0x4e4   : > { %1409 = vrot.lane.b32.xlu1 %v1396_v0, %s2143_s26  ;;  %v1795_v43 = vpop.f32.mrb[13].mxu1 }
 0x54e   : > { %v1402_v44 = vpop.permute.xlu1 %1401 }
 0x54f   : > { %v1412_v46 = vsel %vm742_vm2, %v900_v31, %v1402_v44 }
 0x552   : > { %v1406_v45 = vpop.permute.xlu0 %1405 }
 0x553   : > { %v1413_v47 = vsel %vm498_vm1, %v1412_v46, %v1406_v45 }
 0x556   : > { %v1410_v48 = vpop.permute.xlu1 %1409 }
 0x557   : > { %v1415_v49 = vsel %vm1414_vm4, %v1413_v47, %v1410_v48 }
 0x558   : > { %1813 = vmatmul.mubr.msk.f32.vlgmr.msra.gmra.mrb[8].mxu0 %vm1431_vm5, %v1415_v49 }
 0x62b   : > { %v1501_v51 = vpop.f32.mrb[8].mxu0 }
 0x62c   : > { %v1502_v52 = vadd.f32 %v1677_v50, %v1501_v51  ;;  %v1814_v53 = vpop.f32.mrb[9].mxu0 }
 0x62e   : > { %1505 = vst.msk [vmem:[%s485_s16] sm:$0xff] %vm498_vm1, %v1502_v52 }
 0x62f   : > { %2068 = shalt.err (!%p2065_p7)
}
 0x630   : > { %s2069_s23 = scalar_lea.hbm %s2593_s29, 128  ;;  %s2073_s11 = scalar_lea.hbm %s2702_s9, 256 }
 0x631   : > { %p2070_p0 = scmp.ne.s32.totalorder %s2593_s29, %s2069_s23  ;;  %p2074_p8 = scmp.lt.u32.totalorder %s2593_s29, %s2702_s9 }
 0x632   : > { %p2075_p9 = scmp.lt.u32.totalorder %s2073_s11, %s2069_s23  ;;  %p2077_p10 = scmp.lt.u32.totalorder %s2069_s23, %s2593_s29 }
 0x633   : > { %p2071_p2 = pnand %p2070_p0, %p2703_p3 }
 0x634   : > { %p2076_p12 = por %p2075_p9, %p2074_p8 }
 0x635   : > { %p2072_p11 = pneg %p2071_p2 }
 0x636   : > { %p2078_p13 = por %p2077_p10, %p2076_p12 }
 0x638   : > { %p2079_p4 = pnand %p2078_p13, %p2072_p11 }
 0x63a   : > { %2082 = shalt.err (!%p2079_p4)
}
 0x63b   : > { %1855 = dma.vmem_to_hbm [thread:$0]  (%p2703_p3), %s2595_s14, 128, %s2593_s29, %s1507_s10  }
 0x63c PF: > { %s2704_s21 = sld [smem:[#allocation15_spill]]  ;;  %s2705_s17 = sld [smem:[#allocation21_spill]] }
 0x63d   : > { %s2706_s28 = sld [smem:[#allocation17_spill]] }
 0x642   : > { %s1532_s0 = sand.u32 1, %s2704_s21   ;;  %p2707_p6 = scmp.ne.s32.totalorder %s2705_s17, 0 }
 0x643   : > { %p2708_p5 = scmp.ge.s32.totalorder %s2706_s28, 2  ;;  %s1533_s16 = scalar_lea.sflag [#allocation4], %s1532_s0 }
 0x645   : > { %p1872_p1 = pnand %p2708_p5, %p2707_p6 }
 0x647   : > { %2112 = dma.done.wait (!%p1872_p1), %s1533_s16, 128  }
 0x648   : > { %2114 = vsyncadd (!%p1872_p1), %s1533_s16, 4294967168  ;;  %s2709_s20 = sld [smem:[#allocation18_spill]]  ;;  %s2710_s27 = sld [smem:[#allocation16_spill]] }
 0x649   : > { %s2711_s19 = sld [smem:[#allocation19_spill]]  ;;  %s2712_s17 = smov %s2121_s18 }
 0x64e   : > { %p28_p7 = scmp.ge.s32.totalorder %s2709_s20, 4   ;;  %s2713_s18 = smov %s2710_s27 }
 0x650   :  { %30 = sbr.rel (!%p28_p7) target bundleno = 14 (0xe), region = 137 }
 0x657   :  { %1538 = vsyncpa [#allocation3], 1 }
 0x658   :  { %1540 = vsyncpa [#allocation3 + $0x1], 1 }
 0x659   :  { %1541 = vsyncpa [#allocation6], 1 }
 0x65a   :  { %1543 = vsyncpa [#allocation6 + $0x1], 1 }
 0x65b   :  { %1544 = vsyncpa [#allocation9], 1 }
 0x65c   :  { %1545 = vsyncpa [#allocation4], 1 }
 0x65d   :  { %1547 = vsyncpa [#allocation4 + $0x1], 1 }

</bundles_post_ra>
